<compile_context>
chip_gen: v7x
topology: tpu7x:2x2x1
jax: 0.10.0
libtpu: 0.0.40
codegen_flags: <defaults>
</compile_context>

<pallas_src>
import numpy as np
import jax
import jax.numpy as jnp
from jax import lax
from jax.experimental import pallas as pl
from jax.experimental.pallas import tpu as pltpu

BN_EPS = 1e-5
VMEM_LIMIT = 48 * 1024 * 1024   # fits v7x (64 MiB) with headroom; fine on v5e/v6e


# ---------------------------------------------------------------------------
# Kernel 1: fused 3x3 conv (im2col matmul, BN folded) + ReLU + 1x1 conv.
# Computed transposed so the output lane dim is the (large) M = H*W tile.
# Grid: (B, H*W // TM), both axes parallel.
# ---------------------------------------------------------------------------
def _conv_head_kernel(xcol_ref, w3_ref, b3_ref, w1_ref, b1_ref, z_ref):
    # xcol_ref: (1, 9*Cin, TM) bf16 -- im2col patches, transposed (host-built)
    # w3_ref  : (Cmid, 9*Cin)  bf16 -- 3x3 conv weight with BN scale folded in
    # b3_ref  : (Cmid, 1)      f32  -- folded BN bias
    # w1_ref  : (O, Cmid)      bf16 -- 1x1 conv weight
    # b1_ref  : (O, 1)         f32  -- 1x1 conv bias
    # z_ref   : (1, O, TM)     bf16 -- conv logits (lane-dense, pre-upsample)
    y = jnp.dot(w3_ref[...], xcol_ref[0], preferred_element_type=jnp.float32)
    y = jnp.maximum(y + b3_ref[...], 0.0)                       # (Cmid, TM)
    z = jnp.dot(w1_ref[...], y.astype(jnp.bfloat16),
                preferred_element_type=jnp.float32)             # (O, TM)
    z_ref[0] = (z + b1_ref[...]).astype(z_ref.dtype)


# ---------------------------------------------------------------------------
# Kernel 2: separable bilinear upsample (align_corners=True), H-interp first,
# tiled over Ho.  Writes NCHW output blocks directly.
# Grid: (B, Ho // THo), both axes parallel.
# ---------------------------------------------------------------------------
def _upsample_kernel(z_ref, mh_ref, mwT_ref, o_ref):
    # z_ref  : (1, O, H, W)     bf16 -- conv logits for this batch element
    # mh_ref : (THo, H)         bf16 -- rows of the H-interp matrix for this tile
    # mwT_ref: (W, Wo)          bf16 -- W-interp matrix (transposed)
    # o_ref  : (1, O, THo, Wo)        -- NCHW output tile (lane dim = Wo)
    O, H, W = z_ref.shape[1], z_ref.shape[2], z_ref.shape[3]
    THo = mh_ref.shape[0]
    Wo = mwT_ref.shape[1]

    zb = z_ref[0]                                               # (O, H, W)
    mhb = jnp.broadcast_to(mh_ref[...][None], (O, THo, H))      # (O, THo, H)
    # H-axis interpolation, batched over channels: (O,THo,H) x (O,H,W) -> (O,THo,W)
    th = lax.dot_general(mhb, zb, (((2,), (1,)), ((0,), (0,))),
                         preferred_element_type=jnp.float32)
    th = th.astype(jnp.bfloat16).reshape(O * THo, W)            # leading merge only
    # W-axis interpolation as one deep matmul: (O*THo, W) @ (W, Wo)
    out = jnp.dot(th, mwT_ref[...], preferred_element_type=jnp.float32)
    o_ref[0] = out.reshape(O, THo, Wo).astype(o_ref.dtype)      # leading split only


# ---------------------------------------------------------------------------
# Host-side glue
# ---------------------------------------------------------------------------
def _interp_matrix(n_in, n_out):
    """1-D bilinear interpolation matrix, align_corners=True (PyTorch semantics)."""
    m = np.zeros((n_out, n_in), np.float32)
    if n_out == 1 or n_in == 1:
        m[:, 0] = 1.0
        return m
    dst = np.arange(n_out, dtype=np.float64)
    src = dst * (n_in - 1) / (n_out - 1)
    lo = np.clip(np.floor(src).astype(np.int64), 0, n_in - 1)
    hi = np.minimum(lo + 1, n_in - 1)
    frac = (src - lo).astype(np.float64)
    np.add.at(m, (np.arange(n_out), lo), (1.0 - frac).astype(np.float32))
    np.add.at(m, (np.arange(n_out), hi), frac.astype(np.float32))
    return m


def _pick_tile(total, mult, max_tile):
    """Largest multiple of `mult` that divides `total` and is <= max_tile,
    else the full extent."""
    t = (max_tile // mult) * mult
    while t >= mult:
        if total % t == 0:
            return t
        t -= mult
    return total


def predict_head_pallas(x_nchw, params, scale, *, out_dtype=jnp.float32,
                        tm_max=512, tho_max=256):
    x = x_nchw.astype(jnp.float32)
    B, Cin, H, W = x.shape

    # Fold eval-mode BatchNorm into the (bias-free) 3x3 conv.
    # TODO(synk): training-mode BN (batch statistics) is not implemented; this
    # uses the running stats (eval semantics).
    s = params["gamma"] / jnp.sqrt(params["var"] + BN_EPS)             # (Cmid,)
    Cmid = params["w3"].shape[0]
    # OIHW -> (Cmid, 3, 3, Cin) -> (Cmid, 9*Cin), column order (kh*3+kw)*Cin + c
    w3rT = jnp.transpose(params["w3"], (0, 2, 3, 1)).reshape(Cmid, 9 * Cin)
    w3rT = (w3rT * s[:, None]).astype(jnp.bfloat16)
    b3 = (params["beta"] - params["mean"] * s).reshape(Cmid, 1).astype(jnp.float32)

    w1rT = params["w1"][:, :, 0, 0].astype(jnp.bfloat16)               # (O, Cmid)
    b1 = params["b1"].reshape(-1, 1).astype(jnp.float32)               # (O, 1)
    O = w1rT.shape[0]

    Ho, Wo = int(np.floor(H * scale)), int(np.floor(W * scale))
    mh = jnp.asarray(_interp_matrix(H, Ho), jnp.bfloat16)              # (Ho, H)
    mwT = jnp.asarray(_interp_matrix(W, Wo).T, jnp.bfloat16)           # (W, Wo)

    # Host im2col (zero pad=1), transposed: (B, 9*Cin, H*W) bf16, rows ordered
    # (kh*3+kw)*Cin + c to match w3rT.
    # TODO(synk): for v5e, move im2col into the kernel (H-tiling with a 1-row
    # halo via manual DMA) to avoid the ~9x HBM read amplification.
    xp = jnp.pad(x, ((0, 0), (0, 0), (1, 1), (1, 1)))
    cols = [xp[:, :, kh:kh + H, kw:kw + W] for kh in range(3) for kw in range(3)]
    xcolT = jnp.stack(cols, axis=1).reshape(B, 9 * Cin, H * W).astype(jnp.bfloat16)

    # ---- Stage 1: conv3x3(+BN folded)+ReLU, conv1x1+bias; tiled over M=H*W ----
    M = H * W
    TM = _pick_tile(M, 128, tm_max)
    n_m = M // TM if M % TM == 0 else 1

    zcol = pl.pallas_call(
        _conv_head_kernel,
        out_shape=jax.ShapeDtypeStruct((B, O, M), jnp.bfloat16),
        grid_spec=pltpu.PrefetchScalarGridSpec(
            num_scalar_prefetch=0,
            grid=(B, n_m),
            in_specs=[
                pl.BlockSpec((1, 9 * Cin, TM), lambda b, m: (b, 0, m)),
                pl.BlockSpec((Cmid, 9 * Cin), lambda b, m: (0, 0)),
                pl.BlockSpec((Cmid, 1), lambda b, m: (0, 0)),
                pl.BlockSpec((O, Cmid), lambda b, m: (0, 0)),
                pl.BlockSpec((O, 1), lambda b, m: (0, 0)),
            ],
            out_specs=pl.BlockSpec((1, O, TM), lambda b, m: (b, 0, m)),
        ),
        compiler_params=pltpu.CompilerParams(
            dimension_semantics=("parallel", "parallel"),
            vmem_limit_bytes=VMEM_LIMIT),
    )(xcolT, w3rT, b3, w1rT, b1)

    # Free reshape (no transpose): (B, O, H*W) -> (B, O, H, W)
    z4 = zcol.reshape(B, O, H, W)

    # ---- Stage 2: separable bilinear upsample, tiled over Ho -> NCHW output ----
    THo = _pick_tile(Ho, 8, tho_max)
    n_ho = Ho // THo if Ho % THo == 0 else 1

    # TODO(synk): a fully fused single-kernel variant (keep z in VMEM scratch)
    # would remove the tiny bf16 intermediate round-trip and one launch.
    out = pl.pallas_call(
        _upsample_kernel,
        out_shape=jax.ShapeDtypeStruct((B, O, Ho, Wo), out_dtype),
        grid_spec=pltpu.PrefetchScalarGridSpec(
            num_scalar_prefetch=0,
            grid=(B, n_ho),
            in_specs=[
                pl.BlockSpec((1, O, H, W), lambda b, t: (b, 0, 0, 0)),
                pl.BlockSpec((THo, H), lambda b, t: (t, 0)),
                pl.BlockSpec((W, Wo), lambda b, t: (0, 0)),
            ],
            out_specs=pl.BlockSpec((1, O, THo, Wo), lambda b, t: (b, 0, t, 0)),
        ),
        compiler_params=pltpu.CompilerParams(
            dimension_semantics=("parallel", "parallel"),
            vmem_limit_bytes=VMEM_LIMIT),
    )(z4, mh, mwT)

    return out                                                         # NCHW


# ---------------------------------------------------------------------------
# Pure-JAX f32 reference (for correctness check)
# ---------------------------------------------------------------------------
def predict_head_reference(x_nchw, params, scale):
    s = params["gamma"] / jnp.sqrt(params["var"] + BN_EPS)
    b = params["beta"] - params["mean"] * s
    y = lax.conv_general_dilated(x_nchw, params["w3"], (1, 1),
                                 [(1, 1), (1, 1)],
                                 dimension_numbers=("NCHW", "OIHW", "NCHW"))
    y = jnp.maximum(y * s[None, :, None, None] + b[None, :, None, None], 0.0)
    z = lax.conv_general_dilated(y, params["w1"], (1, 1),
                                 [(0, 0), (0, 0)],
                                 dimension_numbers=("NCHW", "OIHW", "NCHW"))
    z = z + params["b1"][None, :, None, None]
    H, W = z.shape[2], z.shape[3]
    Ho, Wo = int(np.floor(H * scale)), int(np.floor(W * scale))
    mh = jnp.asarray(_interp_matrix(H, Ho))
    mw = jnp.asarray(_interp_matrix(W, Wo))
    t = jnp.einsum("ph,bchw->bcpw", mh, z)
    return jnp.einsum("qw,bcpw->bcpq", mw, t)


# ---------------------------------------------------------------------------
if __name__ == "__main__":
    B, Cin, H, W = 2, 4, 16, 16
    out_planes = 5
    scale = 2

    key = jax.random.PRNGKey(0)
    k1, k2, k3, k4, k5, k6 = jax.random.split(key, 6)
    params = {
        "w3": jax.random.normal(k1, (Cin, Cin, 3, 3), jnp.float32) * 0.1,   # OIHW
        "gamma": 1.0 + 0.1 * jax.random.normal(k2, (Cin,), jnp.float32),
        "beta": 0.1 * jax.random.normal(k3, (Cin,), jnp.float32),
        "mean": jnp.zeros((Cin,), jnp.float32),   # fresh BN running stats
        "var": jnp.ones((Cin,), jnp.float32),
        "w1": jax.random.normal(k4, (out_planes, Cin, 1, 1), jnp.float32) * 0.1,
        "b1": jax.random.normal(k5, (out_planes,), jnp.float32) * 0.1,
    }
    x = jax.random.normal(k6, (B, Cin, H, W), jnp.float32)

    # Small tile caps so the (B, m) / (B, ho) tiling paths are exercised even
    # at this toy size (H*W=256 -> two 128-wide M tiles; Ho=32 -> two Ho tiles).
    out = predict_head_pallas(x, params, scale, tm_max=128, tho_max=16)
    out = jax.block_until_ready(out)

    ref = jax.block_until_ready(predict_head_reference(x, params, scale))
    assert out.shape == (B, out_planes, H * scale, W * scale), out.shape
    # bf16 matmul operands / bf16 intermediate with f32 accumulation.
    assert np.allclose(np.asarray(out), np.asarray(ref), atol=3e-2, rtol=3e-2), \
        float(np.max(np.abs(np.asarray(out) - np.asarray(ref))))

    print("KERNEL_OK")
</pallas_src>

<mosaic_0001>
module attributes {stable_mosaic.version = 11 : i64} {
  func.func @_conv_head_kernel(%arg0: i32, %arg1: i32, %arg2: memref<1x36x128xbf16, #tpu.memory_space<vmem>>, %arg3: memref<4x36xbf16, #tpu.memory_space<vmem>>, %arg4: memref<4x1xf32, #tpu.memory_space<vmem>>, %arg5: memref<5x4xbf16, #tpu.memory_space<vmem>>, %arg6: memref<5x1xf32, #tpu.memory_space<vmem>>, %arg7: memref<1x5x128xbf16, #tpu.memory_space<vmem>>) attributes {dimension_semantics = [#tpu.dimension_semantics<parallel>, #tpu.dimension_semantics<parallel>], iteration_bounds = array<i64: 2, 2>, scalar_prefetch = 0 : i64, scratch_operands = 0 : i64, tpu.core_type = #tpu.core_type<tc>, window_params = [{transform_indices = @transform_0, window_bounds = array<i64: 1, 36, 128>}, {pipeline_mode = #tpu.pipeline_mode<synchronous>, transform_indices = @transform_1, window_bounds = array<i64: 4, 36>}, {pipeline_mode = #tpu.pipeline_mode<synchronous>, transform_indices = @transform_2, window_bounds = array<i64: 4, 1>}, {pipeline_mode = #tpu.pipeline_mode<synchronous>, transform_indices = @transform_3, window_bounds = array<i64: 5, 4>}, {pipeline_mode = #tpu.pipeline_mode<synchronous>, transform_indices = @transform_4, window_bounds = array<i64: 5, 1>}, {transform_indices = @transform_5, window_bounds = array<i64: 1, 5, 128>}]} {
    %c0 = arith.constant 0 : index
    %c0_0 = arith.constant 0 : index
    %0 = vector.load %arg3[%c0, %c0_0] : memref<4x36xbf16, #tpu.memory_space<vmem>>, vector<4x36xbf16>
    %c0_1 = arith.constant 0 : index
    %c0_2 = arith.constant 0 : index
    %c0_3 = arith.constant 0 : index
    %1 = vector.load %arg2[%c0_1, %c0_2, %c0_3] : memref<1x36x128xbf16, #tpu.memory_space<vmem>>, vector<1x36x128xbf16>
    %2 = vector.shape_cast %1 : vector<1x36x128xbf16> to vector<36x128xbf16>
    %cst = arith.constant dense<0.000000e+00> : vector<4x128xf32>
    %3 = tpu.matmul %0, %2, %cst {dimension_numbers = #tpu.dot_dimension_numbers<[1], [0], [0], [1], [0, 0, 1, 1], [], []>} : vector<4x36xbf16>, vector<36x128xbf16>, vector<4x128xf32> -> vector<4x128xf32>
    %c0_4 = arith.constant 0 : index
    %c0_5 = arith.constant 0 : index
    %4 = vector.load %arg4[%c0_4, %c0_5] : memref<4x1xf32, #tpu.memory_space<vmem>>, vector<4x1xf32>
    %5 = vector.broadcast %4 : vector<4x1xf32> to vector<4x128xf32>
    %6 = arith.addf %3, %5 : vector<4x128xf32>
    %cst_6 = arith.constant 0.000000e+00 : f32
    %7 = vector.broadcast %cst_6 : f32 to vector<4x128xf32>
    %8 = arith.maximumf %6, %7 : vector<4x128xf32>
    %c0_7 = arith.constant 0 : index
    %c0_8 = arith.constant 0 : index
    %9 = vector.load %arg5[%c0_7, %c0_8] : memref<5x4xbf16, #tpu.memory_space<vmem>>, vector<5x4xbf16>
    %10 = arith.truncf %8 : vector<4x128xf32> to vector<4x128xbf16>
    %cst_9 = arith.constant dense<0.000000e+00> : vector<5x128xf32>
    %11 = tpu.matmul %9, %10, %cst_9 {dimension_numbers = #tpu.dot_dimension_numbers<[1], [0], [0], [1], [0, 0, 1, 1], [], []>} : vector<5x4xbf16>, vector<4x128xbf16>, vector<5x128xf32> -> vector<5x128xf32>
    %c0_10 = arith.constant 0 : index
    %c0_11 = arith.constant 0 : index
    %12 = vector.load %arg6[%c0_10, %c0_11] : memref<5x1xf32, #tpu.memory_space<vmem>>, vector<5x1xf32>
    %13 = vector.broadcast %12 : vector<5x1xf32> to vector<5x128xf32>
    %14 = arith.addf %11, %13 : vector<5x128xf32>
    %15 = arith.truncf %14 : vector<5x128xf32> to vector<5x128xbf16>
    %c0_12 = arith.constant 0 : index
    %c0_13 = arith.constant 0 : index
    %c0_14 = arith.constant 0 : index
    %16 = vector.load %arg7[%c0_12, %c0_13, %c0_14] : memref<1x5x128xbf16, #tpu.memory_space<vmem>>, vector<1x5x128xbf16>
    %17 = vector.shape_cast %16 : vector<1x5x128xbf16> to vector<5x128xbf16>
    %18 = vector.shape_cast %15 : vector<5x128xbf16> to vector<1x5x128xbf16>
    tpu.vector_store %arg7[%c0_12, %c0_13, %c0_14], %18 {strides = array<i32>} : memref<1x5x128xbf16, #tpu.memory_space<vmem>>, vector<1x5x128xbf16>,
    return
  }
  func.func @transform_0(%arg0: i32, %arg1: i32) -> (i32, i32, i32) {
    %c0_i32 = arith.constant 0 : i32
    %c0_i32_0 = arith.constant 0 : i32
    return %arg0, %c0_i32, %arg1 : i32, i32, i32
  }
  func.func @transform_1(%arg0: i32, %arg1: i32) -> (i32, i32) {
    %c0_i32 = arith.constant 0 : i32
    %c0_i32_0 = arith.constant 0 : i32
    %c0_i32_1 = arith.constant 0 : i32
    return %c0_i32, %c0_i32_0 : i32, i32
  }
  func.func @transform_2(%arg0: i32, %arg1: i32) -> (i32, i32) {
    %c0_i32 = arith.constant 0 : i32
    %c0_i32_0 = arith.constant 0 : i32
    %c0_i32_1 = arith.constant 0 : i32
    return %c0_i32, %c0_i32_0 : i32, i32
  }
  func.func @transform_3(%arg0: i32, %arg1: i32) -> (i32, i32) {
    %c0_i32 = arith.constant 0 : i32
    %c0_i32_0 = arith.constant 0 : i32
    %c0_i32_1 = arith.constant 0 : i32
    return %c0_i32, %c0_i32_0 : i32, i32
  }
  func.func @transform_4(%arg0: i32, %arg1: i32) -> (i32, i32) {
    %c0_i32 = arith.constant 0 : i32
    %c0_i32_0 = arith.constant 0 : i32
    %c0_i32_1 = arith.constant 0 : i32
    return %c0_i32, %c0_i32_0 : i32, i32
  }
  func.func @transform_5(%arg0: i32, %arg1: i32) -> (i32, i32, i32) {
    %c0_i32 = arith.constant 0 : i32
    %c0_i32_0 = arith.constant 0 : i32
    return %arg0, %c0_i32, %arg1 : i32, i32, i32
  }
}

</mosaic_0001>

<bundles_post_ra>
// kernel: tpu_custom_call.1
= control target key start
LH: loop header
LB: loop body
LE: loop exit
PB: predicated region body
PF: predicated region fallthrough
CT: control target
= control target key end

     0   :  { %s725_s18 = smov 0   ;;  %s727_s19 = smov 0   ;;  %s830_s0 = inlined_call_operand.vmem [shape: bf16[2,36,256], index: 0, kind: input, shape index: {}]   ;;  %s831_s1 = inlined_call_operand.vmem [shape: bf16[4,36], index: 1, kind: input, shape index: {}]   ;;  %s832_s2 = inlined_call_operand.vmem [shape: f32[4,1], index: 2, kind: input, shape index: {}]   ;;  %s833_s3 = inlined_call_operand.vmem [shape: bf16[5,4], index: 3, kind: input, shape index: {}]   ;;  %s834_s4 = inlined_call_operand.vmem [shape: f32[5,1], index: 4, kind: input, shape index: {}]   ;;  %s835_s5 = inlined_call_operand.vmem [shape: bf16[2,5,256], index: 5, kind: output, shape index: {}]  }
   0x1   :  { %s729_s20 = smov 0   ;;  %s731_s21 = smov 0  }
   0x2   :  { %s733_s22 = smov 0   ;;  %s735_s23 = smov 0  }
   0x3   :  { %s737_s24 = smov 0  }
   0x4 LB: > { %s24_s25 = sadd.s32 1, %s682_s22  ;;  %s27_s26 = sadd.s32 1, %s686_s23  ;;  %s690_s24 = sphi %s737_s24, %s15_s24   ;;  %s686_s23 = sphi %s735_s23, %s841_s23   ;;  %s682_s22 = sphi %s733_s22, %s840_s22   ;;  %s678_s21 = sphi %s731_s21, %s839_s21   ;;  %s674_s20 = sphi %s729_s20, %s838_s20   ;;  %s670_s19 = sphi %s727_s19, %s837_s19   ;;  %s666_s18 = sphi %s725_s18, %s836_s18  }
   0x5   : > { %p25_p0 = scmp.ge.s32.totalorder %s24_s25, 2  ;;  %p43_p1 = scmp.ne.s32.totalorder %s670_s19, %s666_s18 }
   0x6   : > { %p44_p2 = scmp.eq.s32.totalorder %s690_s24, 0  ;;  %s36_s30 = sadd.s32 1, %s670_s19 }
   0x7   : > { %s843_s25 = smov (%p25_p0, %s24_s25), 0  ;;  %s845_s26 = smov (!%p25_p0, %s27_s26), %s686_s23 }
   0x8   : > { %p45_p3 = por %p44_p2, %p43_p1  ;;  %p29_p4 = scmp.ge.s32.totalorder %s845_s26, 2 }
   0x9   : > { %s32_s27 = ssub.s32 %s682_s22, %s843_s25  ;;  %p536_p6 = scmp.ge.s32.totalorder %s690_s24, 4 }
   0xa   : > { %s847_s26 = smov (%p29_p4, %s845_s26), 0 }
   0xb   : > { %s31_s28 = ssub.s32 %s686_s23, %s847_s26  ;;  %193 = sbr.rel (%p536_p6) target bundleno = 28 (0x1c), region = 32 }
   0xc   : > { %s33_s29 = sor.u32 %s32_s27, %s31_s28 }
   0xd   : > { %p34_p5 = scmp.eq.s32.totalorder %s33_s29, 0 }
   0xf   : > { %s776_s6 = scalar_select %p34_p5, %s670_s19, %s36_s30  }
  0x12   : > { %196 = sbr.rel (!%p45_p3) target bundleno = 28 (0x1c), region = 36  ;;  %s198_s7 = sand.u32 (%p45_p3), 1, %s670_s19  }
  0x13   : > { %s571_s8 = smul.u32 (%p45_p3), 10, %s686_s23 }
  0x14   : > { %s570_s9 = smul.u32 (%p45_p3), 20, %s198_s7 }
  0x15   : > { %s202_s10 = sadd.s32 (%p45_p3), %s682_s22, %s571_s8 }
  0x16   : > { %s537_s11 = sshll.u32 (%p45_p3), %s202_s10, 2  ;;  %s200_s15 = scalar_lea.vmem (%p45_p3), [#allocation2], %s570_s9 }
  0x17   : > { %s204_s14 = scalar_lea.vmem (%p45_p3), %s830_s0, %s537_s11 }
  0x18   : > { %v220_v0 = vld [vmem:[%s204_s14] sm:$0xf] (%p45_p3)  ;;  %v222_v1 = vld [vmem:[%s204_s14 + $0x8] sm:$0xf] (%p45_p3)  ;;  %v224_v2 = vld [vmem:[%s204_s14 + $0x10] sm:$0xf] (%p45_p3) }
  0x19   : > { %221 = vst [vmem:[%s200_s15] sm:$0xf] %v220_v0  ;;  %223 = vst [vmem:[%s200_s15 + $0x4] sm:$0xf] %v222_v1  ;;  %v226_v3 = vld [vmem:[%s204_s14 + $0x18] sm:$0xf] }
  0x1a   : > { %225 = vst [vmem:[%s200_s15 + $0x8] sm:$0xf] %v224_v2  ;;  %v228_v4 = vld [vmem:[%s204_s14 + $0x20] sm:$0xf]  ;;  %227 = vst [vmem:[%s200_s15 + $0xc] sm:$0xf] %v226_v3 }
  0x1b   : > { %229 = vst [vmem:[%s200_s15 + $0x10] sm:$0xf] %v228_v4 }
  0x1c PF: > { %p538_p7 = scmp.ge.s32.totalorder %s690_s24, 1  ;;  %p261_p8 = scmp.lt.s32.totalorder %s690_s24, 5 }
  0x1e   : > { %p262_p9 = pnand %p538_p7, %p261_p8 }
  0x1f   : > { %s268_s16 = sand.u32 (!%p262_p9), 1, %s666_s18   ;;  %v692_v5 = vmov (!%p262_p9), 0.0   ;;  %vm693_vm0 = vmmov (!%p262_p9), 0   ;;  %v313_v6 = vld [vmem:[%s832_s2] sm:$0xf] (!%p262_p9)  ;;  %v694_v7 = vmov (!%p262_p9), 0  }
  0x20   : > { %265 = sbr.rel (%p262_p9) target bundleno = 488 (0x1e8), region = 77  ;;  %554 = vmatprep.subr.bf16.mxu0 (!%p262_p9), %v692_v5  ;;  %560 = vmatprep.mubr.msk.bf16.mxu0 (!%p262_p9), %vm693_vm0, %v692_v5  ;;  %v385_v8 = vld [vmem:[%s834_s4] sm:$0x1f] (!%p262_p9)  ;;  %vm338_vm1 = vcmask (!%p262_p9), 1041408   ;;  %vm334_vm2 = vcmask (!%p262_p9), 293888   ;;  %vm391_vm3 = vcmask (!%p262_p9), 31744  }
  0x21   : > { %s572_s17 = smul.u32 (!%p262_p9), 20, %s268_s16  ;;  %632 = vset.pattern.permute.xlu0 (!%p262_p9), %v694_v7  ;;  %564 = vmatprep.subr.bf16.mxu1 (!%p262_p9), %v692_v5  ;;  %v307_v13 = vld [vmem:[%s831_s1] sm:$0x3] (!%p262_p9)  ;;  %p298_p10 = scmp.lt.s32.totalorder (!%p262_p9), %s678_s21, 1  ;;  %vm439_vm4 = vcmask (!%p262_p9), 1042432  }
  0x22   : > { %316 = vperm.xlu0 (!%p262_p9), %632, %v313_v6   ;;  %566 = vmatprep.mubr.msk.bf16.mxu1 (!%p262_p9), %vm693_vm0, %v692_v5  ;;  %v383_v23 = vld [vmem:[%s833_s3] sm:$0x7] (!%p262_p9)  ;;  %p300_p11 = scmp.lt.s32.totalorder (!%p262_p9), %s674_s20, 1  ;;  %vm440_vm5 = vsmask.f32 (!%p262_p9), 2304 }
  0x23   : > { %s270_s7 = scalar_lea.vmem (!%p262_p9), [#allocation2], %s572_s17  ;;  %vm441_vm6 = vmand (!%p262_p9), %vm439_vm4, %vm440_vm5 }
  0x24   : > { %v633_v9 = vld [vmem:[%s270_s7] sm:$0xff] (!%p262_p9)   ;;  %v634_v10 = vld [vmem:[%s270_s7 + $0x8] sm:$0xff] (!%p262_p9)   ;;  %v635_v11 = vld [vmem:[%s270_s7 + $0x10] ss:$0 sps:$4 sm:$0x33] (!%p262_p9)  }
  0x25   : > { %555 = vmatpush3.bf16.msra.mxu0 (!%p262_p9), %v633_v9  ;;  %v340_v12 = vsel (!%p262_p9), %vm338_vm1, %v635_v11, 0 }
  0x26   : > { %556 = vmatprep.subr.bf16.mxu0 (!%p262_p9), %v692_v5  ;;  %388 = vperm.xlu0 (!%p262_p9), %632, %v385_v8  }
  0x27   : > { %s849_s21 = smov (!%p298_p10, %s678_s21), 1  ;;  %s851_s20 = smov (!%p300_p11, %s674_s20), 1 }
  0x28   : > { %s539_s11 = sshll.u32 %s849_s21, 1 }
  0x29   : > { %557 = vmatpush3.bf16.msra.mxu0 %v634_v10  ;;  %s303_s12 = sadd.s32 %s539_s11, %s851_s20 }
  0x2a   : > { %558 = vmatprep.subr.bf16.mxu0 %v692_v5  ;;  %s540_s13 = sshll.u32 %s303_s12, 2 }
  0x2b   : > { %s305_s16 = scalar_lea.vmem %s835_s5, %s540_s13 }
  0x2c   : > { %v442_v28 = vld [vmem:[%s305_s16] sm:$0x7] }
  0x2d   : > { %559 = vmatpush3.bf16.msra.mxu0 %v340_v12 }
  0x30   : > { %561 = vmatmul.mubr.msk.bf16.vlgmr.msra.gmra.mrb[0].mxu0 %vm334_vm2, %v307_v13 }
  0xa1   : > { %v317_v14 = vpop.permute.xlu0 %316 }
  0xa5   : > { %v389_v24 = vpop.permute.xlu0 %388 }
 0x103   : > { %v376_v15 = vpop.f32.mrb[0].mxu0 }
 0x104   : > { %v377_v16 = vadd.f32 %v376_v15, %v317_v14  ;;  %v562_v17 = vpop.f32.mrb[1].mxu0 }
 0x105   : > { %v379_v18 = vpop.f32.mrb[2].mxu0 }
 0x106   : > { %v382_v19 = vmax.f32 %v377_v16, 0.0  ;;  %v563_v20 = vpop.f32.mrb[3].mxu0 }
 0x108   : > { %v384_v21 = vpack.c.bf16 %v382_v19, %v382_v19 }
 0x10a   : > { %v396_v22 = vsel %vm338_vm1, %v384_v21, 0 }
 0x10b   : > { %565 = vmatpush3.bf16.msra.mxu1 %v396_v22 }
 0x10e   : > { %567 = vmatmul.mubr.msk.bf16.vlgmr.msra.gmra.mrb[0].mxu1 %vm391_vm3, %v383_v23 }
 0x1e1   : > { %v432_v25 = vpop.f32.mrb[0].mxu1 }
 0x1e2   : > { %v433_v26 = vadd.f32 %v432_v25, %v389_v24  ;;  %v568_v27 = vpop.f32.mrb[1].mxu1 }
 0x1e3   : > { %v435_v29 = vpop.f32.mrb[2].mxu1 }
 0x1e4   : > { %v438_v30 = vpack.c.bf16 %v433_v26, %v433_v26  ;;  %v569_v31 = vpop.f32.mrb[3].mxu1 }
 0x1e6   : > { %v443_v32 = vsel %vm441_vm6, %v438_v30, %v442_v28 }
 0x1e7   : > { %444 = vst [vmem:[%s305_s16] sm:$0x7] %v443_v32 }
 0x1e8 PF: > { %s15_s24 = sadd.s32 1, %s690_s24   ;;  %s836_s18 = smov %s670_s19 }
 0x1e9   : > { %p12_p12 = scmp.ge.s32.totalorder %s15_s24, 6   ;;  %s837_s19 = smov %s776_s6 }
 0x1ea   : > { %s838_s20 = smov %s682_s22  ;;  %s839_s21 = smov %s686_s23 }
 0x1eb   : > { %s840_s22 = smov %s843_s25  ;;  %s841_s23 = smov %s847_s26 }
 0x1ec   :  { %14 = sbr.rel (!%p12_p12) target bundleno = 4 (0x4), region = 116 }

</bundles_post_ra>
